<compile_context>
chip_gen: v6e
topology: v6e:2x2x1
jax: 0.10.0
libtpu: 0.0.40
codegen_flags: <defaults>
</compile_context>

<pallas_src>
import functools

import jax
import jax.numpy as jnp
from jax.experimental import pallas as pl
from jax.experimental.pallas import tpu as pltpu

_LN_EPS = 1e-5
# Explicit VMEM budget: plenty for these tiles, and safe on v5e/v6e (128 MiB phys)
# as well as v7x (64 MiB phys per TensorCore).
_VMEM_LIMIT_BYTES = 32 * 1024 * 1024


# --------------------------------------------------------------------------- helpers
def _layer_norm(x, gamma, beta):
    mean = jnp.mean(x, axis=-1, keepdims=True)
    c = x - mean
    var = jnp.mean(c * c, axis=-1, keepdims=True)
    return c * jax.lax.rsqrt(var + _LN_EPS) * gamma + beta


def _erf(x):
    # Abramowitz & Stegun 7.1.26 (max abs err ~1.5e-7).  Uses only mul/add/exp so it
    # lowers to VPU + EUP work without relying on a lax.erf lowering in Mosaic.
    p = 0.3275911
    a1, a2, a3, a4, a5 = 0.254829592, -0.284496736, 1.421413741, -1.453152027, 1.061405429
    sgn = jnp.where(x < 0.0, -1.0, 1.0)
    ax = jnp.abs(x)
    t = 1.0 / (1.0 + p * ax)
    poly = ((((a5 * t + a4) * t + a3) * t + a2) * t + a1) * t
    return sgn * (1.0 - poly * jnp.exp(-ax * ax))


def _gelu_exact(x):
    # Matches torch.nn.GELU() (erf form) to ~1e-7.
    return 0.5 * x * (1.0 + _erf(x * 0.7071067811865476))


def _row_tile(rows, target=512):
    """Largest row tile <= target that divides `rows` (multiple of 16), else full."""
    if rows <= target:
        return rows
    t = (target // 16) * 16
    while t >= 16:
        if rows % t == 0:
            return t
        t -= 16
    return rows


# --------------------------------------------------------------------------- kernels
def _ln_qkv_kernel(x_ref, g_ref, b_ref, w_ref, bias_ref, qkv_ref):
    # x_ref: (tm, E) f32 rows of the residual stream; w_ref: (E, 3E) fused QKV weights
    # (Q columns already pre-scaled by 1/sqrt(E) in the wrapper).
    xn = _layer_norm(x_ref[...], g_ref[...], b_ref[...])                # f32
    qkv = jnp.dot(xn.astype(w_ref.dtype), w_ref[...],
                  preferred_element_type=jnp.float32) + bias_ref[...]   # f32 accum
    qkv_ref[...] = qkv.astype(qkv_ref.dtype)


def _attention_kernel(q_ref, k_ref, v_ref, o_ref, *, approx_recip):
    # Refs are (H, N, D): all heads of one batch element, one batched contraction.
    energy = jnp.einsum("hqd,hkd->hqk", q_ref[...], k_ref[...],
                        preferred_element_type=jnp.float32)             # (H, N, N) f32
    m = jnp.max(energy, axis=-1, keepdims=True)
    e = jnp.exp(energy - m)                                             # softmax in f32
    s = jnp.sum(e, axis=-1, keepdims=True)
    att = e * pl.reciprocal(s, approx=approx_recip)                     # EUP slot
    # TODO(synk): attention dropout (att_drop) is identity in eval mode; mask=None only.
    ctx = jnp.einsum("hqk,hkd->hqd", att.astype(v_ref.dtype), v_ref[...],
                     preferred_element_type=jnp.float32)                # (H, N, D)
    o_ref[...] = ctx.astype(o_ref.dtype)


def _proj_ffn_kernel(x_ref, c_ref, wp_ref, bp_ref, g2_ref, be2_ref,
                     w1_ref, bf1_ref, w2_ref, bf2_ref, o_ref):
    x = x_ref[...]                                                      # (tm, E) f32 residual
    proj = jnp.dot(c_ref[...], wp_ref[...],
                   preferred_element_type=jnp.float32) + bp_ref[...]
    y1 = x + proj                                                       # residual (dropout = id)
    xn2 = _layer_norm(y1, g2_ref[...], be2_ref[...])
    h = jnp.dot(xn2.astype(w1_ref.dtype), w1_ref[...],
                preferred_element_type=jnp.float32) + bf1_ref[...]
    h = _gelu_exact(h)                                                  # exact (erf) GELU, f32
    y2 = jnp.dot(h.astype(w2_ref.dtype), w2_ref[...],
                 preferred_element_type=jnp.float32) + bf2_ref[...]
    o_ref[...] = (y1 + y2).astype(o_ref.dtype)                          # residual (dropout = id)


# --------------------------------------------------------------------------- wrappers
def _encoder_block(x, p, *, num_heads, compute_dtype):
    B, N, E = x.shape
    H = num_heads
    D = E // H
    rows = B * N
    tm = _row_tile(rows)
    grid_rows = rows // tm
    cdt = compute_dtype

    cparams = pltpu.CompilerParams(
        dimension_semantics=("parallel",),
        vmem_limit_bytes=_VMEM_LIMIT_BYTES)

    x2 = x.reshape(rows, E)

    def w_spec(arr):  # full-array (weights / biases / LN params), constant index map
        return pl.BlockSpec(arr.shape, lambda i: (0, 0))

    row_spec = pl.BlockSpec((tm, E), lambda i: (i, 0))
    qkv_spec = pl.BlockSpec((tm, 3 * E), lambda i: (i, 0))

    # Fold the 1/sqrt(E) attention scale into the Q weights/bias once (wrapper side),
    # fuse Q/K/V into a single (E, 3E) matmul, and cast weights to bf16 (halves the
    # weight DMA bytes; accumulation stays f32 in-kernel).
    inv_scale = 1.0 / (E ** 0.5)
    w_qkv = jnp.concatenate([p["wq"] * inv_scale, p["wk"], p["wv"]], axis=1).astype(cdt)
    b_qkv = jnp.concatenate([p["bq"] * inv_scale, p["bk"], p["bv"]], axis=1)

    qkv2 = pl.pallas_call(
        _ln_qkv_kernel,
        grid=(grid_rows,),
        in_specs=[row_spec,
                  w_spec(p["ln1_g"]), w_spec(p["ln1_b"]),
                  w_spec(w_qkv), w_spec(b_qkv)],
        out_specs=qkv_spec,
        out_shape=jax.ShapeDtypeStruct((rows, 3 * E), cdt),
        compiler_params=cparams,
    )(x2, p["ln1_g"], p["ln1_b"], w_qkv, b_qkv)

    # Layout plumbing (plain XLA): (B*N, 3E) -> three (B, H, N, D) head tensors.
    q2 = qkv2[:, :E]
    k2 = qkv2[:, E:2 * E]
    v2 = qkv2[:, 2 * E:]

    def to_heads(t):
        return t.reshape(B, N, H, D).transpose(0, 2, 1, 3)

    head_spec = pl.BlockSpec((None, H, N, D), lambda b: (b, 0, 0, 0))
    approx_recip = bool(jnp.dtype(cdt) != jnp.dtype(jnp.float32))
    ctx = pl.pallas_call(
        functools.partial(_attention_kernel, approx_recip=approx_recip),
        grid=(B,),
        in_specs=[head_spec, head_spec, head_spec],
        out_specs=head_spec,
        out_shape=jax.ShapeDtypeStruct((B, H, N, D), cdt),
        compiler_params=cparams,
    )(to_heads(q2), to_heads(k2), to_heads(v2))

    # Merge heads back into a lane-dense (rows, E) slab for the projection.
    ctx2 = ctx.transpose(0, 2, 1, 3).reshape(rows, E)

    wp = p["wp"].astype(cdt)
    w1 = p["w1"].astype(cdt)
    w2 = p["w2"].astype(cdt)

    out = pl.pallas_call(
        _proj_ffn_kernel,
        grid=(grid_rows,),
        in_specs=[row_spec, row_spec,
                  w_spec(wp), w_spec(p["bp"]),
                  w_spec(p["ln2_g"]), w_spec(p["ln2_b"]),
                  w_spec(w1), w_spec(p["bf1"]),
                  w_spec(w2), w_spec(p["bf2"])],
        out_specs=row_spec,
        out_shape=jax.ShapeDtypeStruct((rows, E), x.dtype),
        compiler_params=cparams,
    )(x2, ctx2, wp, p["bp"], p["ln2_g"], p["ln2_b"], w1, p["bf1"], w2, p["bf2"])

    return out.reshape(B, N, E)


def transformer_encoder(x, params, *, num_heads, compute_dtype=jnp.bfloat16):
    """x: (B, N, E) f32.  params: list (depth) of per-layer dicts (see _init_params)."""
    for p in params:
        x = _encoder_block(x, p, num_heads=num_heads, compute_dtype=compute_dtype)
    return x


# --------------------------------------------------------------------------- params / ref
def _init_params(key, depth, emb_size, expansion=4):
    """nn.Linear-style init; weights stored (in, out) = transpose of PyTorch (out, in)."""
    def linear(k, fan_in, fan_out):
        kw, kb = jax.random.split(k)
        bound = 1.0 / (fan_in ** 0.5)
        w = jax.random.uniform(kw, (fan_in, fan_out), jnp.float32, -bound, bound)
        b = jax.random.uniform(kb, (1, fan_out), jnp.float32, -bound, bound)
        return w, b

    hidden = expansion * emb_size
    layers = []
    for lk in jax.random.split(key, depth):
        k = jax.random.split(lk, 6)
        wq, bq = linear(k[0], emb_size, emb_size)
        wk, bk = linear(k[1], emb_size, emb_size)
        wv, bv = linear(k[2], emb_size, emb_size)
        wp, bp = linear(k[3], emb_size, emb_size)
        w1, bf1 = linear(k[4], emb_size, hidden)
        w2, bf2 = linear(k[5], hidden, emb_size)
        layers.append(dict(
            ln1_g=jnp.ones((1, emb_size), jnp.float32),
            ln1_b=jnp.zeros((1, emb_size), jnp.float32),
            wq=wq, bq=bq, wk=wk, bk=bk, wv=wv, bv=bv, wp=wp, bp=bp,
            ln2_g=jnp.ones((1, emb_size), jnp.float32),
            ln2_b=jnp.zeros((1, emb_size), jnp.float32),
            w1=w1, bf1=bf1, w2=w2, bf2=bf2))
    return layers


def _reference(x, params, num_heads):
    """Pure-JAX f32 reference of the PyTorch forward (eval mode, mask=None)."""
    B, N, E = x.shape
    H, D = num_heads, E // num_heads

    def ln(t, g, b):
        mu = t.mean(-1, keepdims=True)
        var = ((t - mu) ** 2).mean(-1, keepdims=True)
        return (t - mu) / jnp.sqrt(var + _LN_EPS) * g + b

    for p in params:
        xn = ln(x, p["ln1_g"], p["ln1_b"])
        q = (xn @ p["wq"] + p["bq"]).reshape(B, N, H, D).transpose(0, 2, 1, 3)
        k = (xn @ p["wk"] + p["bk"]).reshape(B, N, H, D).transpose(0, 2, 1, 3)
        v = (xn @ p["wv"] + p["bv"]).reshape(B, N, H, D).transpose(0, 2, 1, 3)
        energy = jnp.einsum("bhqd,bhkd->bhqk", q, k) / (E ** 0.5)   # module scales by sqrt(E)
        att = jax.nn.softmax(energy, axis=-1)
        out = jnp.einsum("bhqk,bhkd->bhqd", att, v)
        out = out.transpose(0, 2, 1, 3).reshape(B, N, E)
        x = x + (out @ p["wp"] + p["bp"])
        xn2 = ln(x, p["ln2_g"], p["ln2_b"])
        h = jax.nn.gelu(xn2 @ p["w1"] + p["bf1"], approximate=False)
        x = x + (h @ p["w2"] + p["bf2"])
    return x


# --------------------------------------------------------------------------- main
if __name__ == "__main__":
    # Module default num_heads=10 -> emb_size must be divisible by 10.
    B, N, E, depth, num_heads = 2, 8, 40, 2, 10

    key = jax.random.PRNGKey(0)
    kx, kp = jax.random.split(key)
    x = jax.random.normal(kx, (B, N, E), dtype=jnp.float32)
    params = _init_params(kp, depth, E)

    ref = _reference(x, params, num_heads)

    # Default path: bf16 matmul inputs, f32 accumulation (full MXU rate on v5e/v6e/v7x).
    out = transformer_encoder(x, params, num_heads=num_heads, compute_dtype=jnp.bfloat16)
    out = jax.block_until_ready(out)
    assert out.shape == (B, N, E)
    assert float(jnp.max(jnp.abs(out - ref))) < 0.25, "bf16 kernel diverged from reference"

    # f32 path for a tight numerical check of the kernel math itself.
    out_f32 = transformer_encoder(x, params, num_heads=num_heads, compute_dtype=jnp.float32)
    out_f32 = jax.block_until_ready(out_f32)
    assert jnp.allclose(out_f32, ref, atol=5e-3, rtol=5e-3), "f32 kernel mismatch vs reference"

    print("KERNEL_OK")
</pallas_src>

<mosaic_0001>
module attributes {stable_mosaic.version = 11 : i64} {
  func.func @_ln_qkv_kernel(%arg0: i32, %arg1: memref<16x40xf32, #tpu.memory_space<vmem>>, %arg2: memref<1x40xf32, #tpu.memory_space<vmem>>, %arg3: memref<1x40xf32, #tpu.memory_space<vmem>>, %arg4: memref<40x120xbf16, #tpu.memory_space<vmem>>, %arg5: memref<1x120xf32, #tpu.memory_space<vmem>>, %arg6: memref<16x120xbf16, #tpu.memory_space<vmem>>) attributes {dimension_semantics = [#tpu.dimension_semantics<parallel>], iteration_bounds = array<i64: 1>, scalar_prefetch = 0 : i64, scratch_operands = 0 : i64, tpu.core_type = #tpu.core_type<tc>, window_params = [{transform_indices = @transform_0, window_bounds = array<i64: 16, 40>}, {pipeline_mode = #tpu.pipeline_mode<synchronous>, transform_indices = @transform_1, window_bounds = array<i64: 1, 40>}, {pipeline_mode = #tpu.pipeline_mode<synchronous>, transform_indices = @transform_2, window_bounds = array<i64: 1, 40>}, {pipeline_mode = #tpu.pipeline_mode<synchronous>, transform_indices = @transform_3, window_bounds = array<i64: 40, 120>}, {pipeline_mode = #tpu.pipeline_mode<synchronous>, transform_indices = @transform_4, window_bounds = array<i64: 1, 120>}, {transform_indices = @transform_5, window_bounds = array<i64: 16, 120>}]} {
    %c0 = arith.constant 0 : index
    %c0_0 = arith.constant 0 : index
    %0 = vector.load %arg1[%c0, %c0_0] : memref<16x40xf32, #tpu.memory_space<vmem>>, vector<16x40xf32>
    %c0_1 = arith.constant 0 : index
    %c0_2 = arith.constant 0 : index
    %1 = vector.load %arg2[%c0_1, %c0_2] : memref<1x40xf32, #tpu.memory_space<vmem>>, vector<1x40xf32>
    %c0_3 = arith.constant 0 : index
    %c0_4 = arith.constant 0 : index
    %2 = vector.load %arg3[%c0_3, %c0_4] : memref<1x40xf32, #tpu.memory_space<vmem>>, vector<1x40xf32>
    %cst = arith.constant dense<0.000000e+00> : vector<16xf32>
    %3 = vector.multi_reduction <add>, %0, %cst [1] : vector<16x40xf32> to vector<16xf32>
    %4 = vector.shape_cast %3 : vector<16xf32> to vector<16x1xf32>
    %cst_5 = arith.constant 4.000000e+01 : f32
    %5 = vector.broadcast %cst_5 : f32 to vector<16x1xf32>
    %6 = arith.divf %4, %5 : vector<16x1xf32>
    %7 = vector.broadcast %6 : vector<16x1xf32> to vector<16x40xf32>
    %8 = arith.subf %0, %7 : vector<16x40xf32>
    %9 = arith.mulf %8, %8 : vector<16x40xf32>
    %cst_6 = arith.constant dense<0.000000e+00> : vector<16xf32>
    %10 = vector.multi_reduction <add>, %9, %cst_6 [1] : vector<16x40xf32> to vector<16xf32>
    %11 = vector.shape_cast %10 : vector<16xf32> to vector<16x1xf32>
    %cst_7 = arith.constant 4.000000e+01 : f32
    %12 = vector.broadcast %cst_7 : f32 to vector<16x1xf32>
    %13 = arith.divf %11, %12 : vector<16x1xf32>
    %cst_8 = arith.constant 9.99999974E-6 : f32
    %14 = vector.broadcast %cst_8 : f32 to vector<16x1xf32>
    %15 = arith.addf %13, %14 : vector<16x1xf32>
    %16 = math.rsqrt %15 : vector<16x1xf32>
    %17 = vector.broadcast %16 : vector<16x1xf32> to vector<16x40xf32>
    %18 = arith.mulf %8, %17 : vector<16x40xf32>
    %19 = vector.broadcast %1 : vector<1x40xf32> to vector<16x40xf32>
    %20 = arith.mulf %18, %19 : vector<16x40xf32>
    %21 = vector.broadcast %2 : vector<1x40xf32> to vector<16x40xf32>
    %22 = arith.addf %20, %21 : vector<16x40xf32>
    %23 = arith.truncf %22 : vector<16x40xf32> to vector<16x40xbf16>
    %c0_9 = arith.constant 0 : index
    %c0_10 = arith.constant 0 : index
    %24 = vector.load %arg4[%c0_9, %c0_10] : memref<40x120xbf16, #tpu.memory_space<vmem>>, vector<40x120xbf16>
    %cst_11 = arith.constant dense<0.000000e+00> : vector<16x120xf32>
    %25 = tpu.matmul %23, %24, %cst_11 {dimension_numbers = #tpu.dot_dimension_numbers<[1], [0], [0], [1], [0, 0, 1, 1], [], []>} : vector<16x40xbf16>, vector<40x120xbf16>, vector<16x120xf32> -> vector<16x120xf32>
    %c0_12 = arith.constant 0 : index
    %c0_13 = arith.constant 0 : index
    %26 = vector.load %arg5[%c0_12, %c0_13] : memref<1x120xf32, #tpu.memory_space<vmem>>, vector<1x120xf32>
    %27 = vector.broadcast %26 : vector<1x120xf32> to vector<16x120xf32>
    %28 = arith.addf %25, %27 : vector<16x120xf32>
    %29 = arith.truncf %28 : vector<16x120xf32> to vector<16x120xbf16>
    %c0_14 = arith.constant 0 : index
    %c0_15 = arith.constant 0 : index
    %30 = vector.load %arg6[%c0_14, %c0_15] : memref<16x120xbf16, #tpu.memory_space<vmem>>, vector<16x120xbf16>
    tpu.vector_store %arg6[%c0_14, %c0_15], %29 {strides = array<i32>} : memref<16x120xbf16, #tpu.memory_space<vmem>>, vector<16x120xbf16>,
    return
  }
  func.func @transform_0(%arg0: i32) -> (i32, i32) {
    %c0_i32 = arith.constant 0 : i32
    %c0_i32_0 = arith.constant 0 : i32
    return %arg0, %c0_i32 : i32, i32
  }
  func.func @transform_1(%arg0: i32) -> (i32, i32) {
    %c0_i32 = arith.constant 0 : i32
    %c0_i32_0 = arith.constant 0 : i32
    %c0_i32_1 = arith.constant 0 : i32
    return %c0_i32, %c0_i32_0 : i32, i32
  }
  func.func @transform_2(%arg0: i32) -> (i32, i32) {
    %c0_i32 = arith.constant 0 : i32
    %c0_i32_0 = arith.constant 0 : i32
    %c0_i32_1 = arith.constant 0 : i32
    return %c0_i32, %c0_i32_0 : i32, i32
  }
  func.func @transform_3(%arg0: i32) -> (i32, i32) {
    %c0_i32 = arith.constant 0 : i32
    %c0_i32_0 = arith.constant 0 : i32
    %c0_i32_1 = arith.constant 0 : i32
    return %c0_i32, %c0_i32_0 : i32, i32
  }
  func.func @transform_4(%arg0: i32) -> (i32, i32) {
    %c0_i32 = arith.constant 0 : i32
    %c0_i32_0 = arith.constant 0 : i32
    %c0_i32_1 = arith.constant 0 : i32
    return %c0_i32, %c0_i32_0 : i32, i32
  }
  func.func @transform_5(%arg0: i32) -> (i32, i32) {
    %c0_i32 = arith.constant 0 : i32
    %c0_i32_0 = arith.constant 0 : i32
    return %arg0, %c0_i32 : i32, i32
  }
}

</mosaic_0001>

<bundles_post_ra>
// kernel: tpu_custom_call.1
= control target key start
LH: loop header
LB: loop body
LE: loop exit
PB: predicated region body
PF: predicated region fallthrough
CT: control target
= control target key end

     0   :  { %10 = vsyncpa [#allocation3], 0  ;;  %s378_s0 = inlined_call_operand.hbm [shape: f32[16,40], index: 0, kind: input, shape index: {}]   ;;  %s379_s1 = inlined_call_operand.vmem [shape: f32[1,40], index: 1, kind: input, shape index: {}]   ;;  %s380_s2 = inlined_call_operand.vmem [shape: f32[1,40], index: 2, kind: input, shape index: {}]   ;;  %s381_s3 = inlined_call_operand.hbm [shape: bf16[40,120], index: 3, kind: input, shape index: {}]   ;;  %s382_s4 = inlined_call_operand.vmem [shape: f32[1,120], index: 4, kind: input, shape index: {}]   ;;  %s383_s5 = inlined_call_operand.hbm [shape: bf16[16,120], index: 5, kind: output, shape index: {}]  }
   0x1   :  { %11 = vsyncpa [#allocation6], 0 }
   0x2   :  { %12 = vsyncpa [#allocation4], 0  ;;  %s310_s18 = smov [#allocation2]  }
   0x3   :  { %s18_s19 = sshll.u32 %s310_s18, 4  ;;  %s19_s19 = int_to_ptr.vmem [resolvable:$true] %s18_s19 }
   0x4   :  { %s252_s20 = scalar_lea.vmem %s19_s19, 256  ;;  %p257_p1 = scmp.lt.s32.totalorder %s19_s19, %s19_s19 }
   0x5   :  { %p253_p0 = scmp.ne.s32.totalorder %s19_s19, %s252_s20  ;;  %p258_p2 = scmp.lt.s32.totalorder %s252_s20, %s252_s20 }
   0x7   :  { %p259_p3 = por %p258_p2, %p257_p1 }
   0x9   :  { %p260_p4 = pnand %p259_p3, %p253_p0 }
   0xb   :  { %263 = shalt.err (!%p260_p4)
}
   0xc   :  { %s311_s21 = smov 128   ;;  %s312_s22 = smov 8  }
   0xd   :  { %24 = dma.hbm_to_vmem [thread:$0]  %s378_s0, 256, %s19_s19, [#allocation3], %s311_s21, %s311_s21, %s312_s22  }
   0xe   :  { %s313_s25 = smov [#allocation5]  }
   0xf   :  { %s34_s26 = sshll.u32 %s313_s25, 4  ;;  %s35_s26 = int_to_ptr.vmem [resolvable:$true] %s34_s26 }
  0x10   :  { %s272_s27 = scalar_lea.vmem %s35_s26, 320  ;;  %p277_p6 = scmp.lt.s32.totalorder %s35_s26, %s35_s26 }
  0x11   :  { %p273_p5 = scmp.ne.s32.totalorder %s35_s26, %s272_s27  ;;  %p278_p7 = scmp.lt.s32.totalorder %s272_s27, %s272_s27 }
  0x13   :  { %p279_p8 = por %p278_p7, %p277_p6 }
  0x15   :  { %p280_p9 = pnand %p279_p8, %p273_p5 }
  0x17   :  { %283 = shalt.err (!%p280_p9)
}
  0x18   :  { %s314_s28 = smov 64   ;;  %s315_s29 = smov 4  }
  0x19   :  { %40 = dma.hbm_to_vmem [thread:$0]  %s381_s3, 320, %s35_s26, [#allocation6], %s314_s28, %s314_s28, %s315_s29  }
  0x1a   :  { %304 = dma.done.wait [#allocation3], 256  }
  0x1b   :  { %305 = vsyncadd [#allocation3], 4294967040 }
  0x1c   :  { %306 = dma.done.wait [#allocation6], 320  }
  0x1d   :  { %307 = vsyncadd [#allocation6], 4294966976  ;;  %vm54_vm0 = vcmask 326656   ;;  %v50_v0 = vld [vmem:[#allocation2] sm:$0xff]  ;;  %v51_v1 = vld [vmem:[#allocation2 + $0x8] sm:$0xff]  ;;  %vm129_vm1 = vcmask 1043456  }
  0x1e   :  { %v55_v2 = vsel %vm54_vm0, %v50_v0, 0.0  ;;  %v58_v3 = vsel %vm54_vm0, %v51_v1, 0.0  ;;  %v237_v14 = vld [vmem:[#allocation5 + $0x10] ss:$0 sps:$4 sm:$0xff]   ;;  %v316_v15 = vmov 0.0   ;;  %vm317_vm2 = vmmov 0  }
  0x1f   :  { %56 = vadd.xlane.f32.xlu0 %v55_v2  ;;  %218 = vmatprep.subr.bf16.mxu0 %v316_v15  ;;  %v131_v16 = vsel %vm129_vm1, %v237_v14, 0  ;;  %v238_v17 = vld [vmem:[#allocation5 + $0x8] sm:$0xff]   ;;  %v239_v18 = vld [vmem:[#allocation5] sm:$0xff]   ;;  %v203_v27 = vld [vmem:[%s379_s1] ss:$0 sm:$0xff]  ;;  %vm182_vm3 = vcmask 977920  }
  0x20   :  { %224 = vmatprep.mubr.msk.bf16.mxu0 %vm317_vm2, %v316_v15  ;;  %219 = vmatpush3.bf16.msra.mxu0 %v131_v16  ;;  %v204_v31 = vld [vmem:[%s380_s2] ss:$0 sm:$0xff]  ;;  %s318_s1 = smov [#allocation7]  }
  0x21   :  { %220 = vmatprep.subr.bf16.mxu0 %v316_v15  ;;  %v205_v36 = vld [vmem:[%s382_s4] ss:$0 sm:$0xff]  ;;  %s190_s11 = sshll.u32 %s318_s1, 4  ;;  %s191_s11 = int_to_ptr.vmem [resolvable:$true] %s190_s11 }
  0x22   :  { %s284_s2 = scalar_lea.vmem %s191_s11, 128  ;;  %p289_p11 = scmp.lt.s32.totalorder %s191_s11, %s191_s11 }
  0x23   :  { %59 = vadd.xlane.f32.xlu0 %v58_v3  ;;  %p285_p10 = scmp.ne.s32.totalorder %s191_s11, %s284_s2  ;;  %p290_p12 = scmp.lt.s32.totalorder %s284_s2, %s284_s2 }
  0x24   :  { %221 = vmatpush3.bf16.msra.mxu0 %v238_v17 }
  0x25   :  { %222 = vmatprep.subr.bf16.mxu0 %v316_v15  ;;  %p291_p13 = por %p290_p12, %p289_p11 }
  0x27   :  { %p292_p0 = pnand %p291_p13, %p285_p10 }
  0x28   :  { %223 = vmatpush3.bf16.msra.mxu0 %v239_v18 }
  0xa8   :  { %v57_v4 = vpop.xlane.xlu0 %56 }
  0xa9   :  { %v62_v5 = vmul.f32 0.025, %v57_v4 }
  0xab   :  { %v64_v6 = vsub.f32 %v50_v0, %v62_v5 }
  0xac   :  { %v60_v7 = vpop.xlane.xlu0 %59 }
  0xad   :  { %v63_v8 = vmul.f32 0.025, %v60_v7  ;;  %v66_v9 = vmul.f32 %v64_v6, %v64_v6 }
  0xaf   :  { %v65_v10 = vsub.f32 %v51_v1, %v63_v8  ;;  %v68_v11 = vsel %vm54_vm0, %v66_v9, 0.0 }
  0xb0   :  { %69 = vadd.xlane.f32.xlu1 %v68_v11 }
  0xb1   :  { %v67_v12 = vmul.f32 %v65_v10, %v65_v10 }
  0xb3   :  { %v71_v13 = vsel %vm54_vm0, %v67_v12, 0.0 }
  0xb4   :  { %72 = vadd.xlane.f32.xlu1 %v71_v13 }
 0x139   :  { %v70_v19 = vpop.xlane.xlu1 %69 }
 0x13a   :  { %v74_v20 = vmul.f32 0.025, %v70_v19 }
 0x13c   :  { %v76_v21 = vadd.f32 1e-05, %v74_v20 }
 0x13d   :  { %v73_v22 = vpop.xlane.xlu1 %72 }
 0x13e   :  { %240 = vrsqrt.f32 %v76_v21  ;;  %v75_v23 = vmul.f32 0.025, %v73_v22 }
 0x140   :  { %v77_v24 = vadd.f32 1e-05, %v75_v23 }
 0x142   :  { %242 = vrsqrt.f32 %v77_v24 }
 0x14b   :  { %v241_v25 = vpop.eup %240 }
 0x14c   :  { %v80_v26 = vmul.f32 %v241_v25, %v64_v6 }
 0x14e   :  { %v88_v30 = vmul.f32 %v203_v27, %v80_v26 }
 0x14f   :  { %v243_v28 = vpop.eup %242 }
 0x150   :  { %v81_v29 = vmul.f32 %v243_v28, %v65_v10  ;;  %v96_v33 = vadd.f32 %v204_v31, %v88_v30 }
 0x152   :  { %v89_v32 = vmul.f32 %v203_v27, %v81_v29 }
 0x154   :  { %v97_v34 = vadd.f32 %v204_v31, %v89_v32 }
 0x156   :  { %v98_v35 = vpack.c.bf16 %v97_v34, %v96_v33 }
 0x158   :  { %225 = vmatmul.mubr.msk.bf16.vlgmr.msra.gmra.mxu0 %vm54_vm0, %v98_v35 }
 0x218   :  { %v167_v37 = vpop.f32.mrf.mxu0 }
 0x219   :  { %v168_v38 = vadd.f32 %v205_v36, %v167_v37 }
 0x21a   :  { %v226_v39 = vpop.f32.mrf.mxu0 }
 0x21b   :  { %v212_v40 = vpack.c.bf16 %v168_v38, %v168_v38 }
 0x21c   :  { %v170_v41 = vpop.f32.mrf.mxu0 }
 0x21d   :  { %v171_v42 = vadd.f32 %v205_v36, %v170_v41  ;;  %183 = vst.msk [vmem:[#allocation7] sm:$0xf] %vm182_vm3, %v212_v40 }
 0x21e   :  { %v227_v43 = vpop.f32.mrf.mxu0 }
 0x21f   :  { %v213_v44 = vpack.c.bf16 %v171_v42, %v171_v42 }
 0x221   :  { %184 = vst.msk [vmem:[#allocation7 + $0x4] sm:$0xf] %vm182_vm3, %v213_v44 }
 0x222   :  { %295 = shalt.err (!%p292_p0)
}
 0x223   :  { %196 = dma.vmem_to_hbm [thread:$0]  %s191_s11, 128, %s383_s5, [#allocation4], %s314_s28, %s314_s28, %s315_s29  }
 0x224   :  { %308 = dma.done.wait [#allocation4], 128  }
 0x225   :  { %309 = vsyncadd [#allocation4], 4294967168 }
 0x226   :  { %200 = vsyncpa [#allocation3], 1 }
 0x227   :  { %201 = vsyncpa [#allocation6], 1 }
 0x228   :  { %202 = vsyncpa [#allocation4], 1 }

</bundles_post_ra>
